<compile_context>
chip_gen: v7x
topology: tpu7x:2x2x1
jax: 0.10.0
libtpu: 0.0.40
codegen_flags: <defaults>
</compile_context>

<pallas_src>
import functools

import jax
import jax.numpy as jnp
from jax.experimental import pallas as pl
from jax.experimental.pallas import tpu as pltpu


def mine_kernel(z_ref, w_ref, b_ref, w2t0_ref, w2t1_ref, out_ref,
                s0_sc, m_sc, l_sc, *, n_rows, tile_rows, needs_mask):
    i = pl.program_id(0)

    @pl.when(i == 0)
    def _init():
        s0_sc[...] = jnp.zeros_like(s0_sc)
        m_sc[...] = jnp.full_like(m_sc, -jnp.inf)
        l_sc[...] = jnp.zeros_like(l_sc)

    # Fused first layer: one matmul gives both pre-activations, (TN, 2H), f32.
    pre = jnp.dot(z_ref[...], w_ref[...],
                  preferred_element_type=jnp.float32) + b_ref[...]
    h = jnp.maximum(pre, 0.0)                                   # (TN, 2H)

    if needs_mask:
        # Rows past the true batch size were zero-padded in the wrapper; mask
        # them out of both reductions. Emitted only when N % tile != 0.
        row = jax.lax.broadcasted_iota(jnp.int32, (tile_rows, 1), 0) + i * tile_rows
        valid = row < n_rows                                     # (TN, 1)
        h = jnp.where(valid, h, 0.0)

    # T0 branch: only sum over rows is needed -> column-sum, then tiny VPU dot.
    col = jnp.sum(h, axis=0, keepdims=True)                     # (1, 2H)
    s0_sc[...] += jnp.sum(col * w2t0_ref[...], axis=1, keepdims=True)   # (1, 1)

    # T1 branch: per-row values for exp(), as VPU multiply + lane reduce.
    t1 = jnp.sum(h * w2t1_ref[...], axis=1, keepdims=True)      # (TN, 1)
    if needs_mask:
        t1 = jnp.where(valid, t1, -jnp.inf)                     # padded rows -> exp()==0

    # Online (max-subtracted) logsumexp across grid steps.
    m_prev = m_sc[...]                                          # (1, 1)
    tile_max = jnp.max(t1, axis=0, keepdims=True)               # (1, 1)
    m_new = jnp.maximum(m_prev, tile_max)                       # (1, 1)
    tile_sum = jnp.sum(jnp.exp(t1 - m_new), axis=0, keepdims=True)
    l_sc[...] = l_sc[...] * jnp.exp(m_prev - m_new) + tile_sum
    m_sc[...] = m_new

    @pl.when(i == pl.num_programs(0) - 1)
    def _finalize():
        inv_n = jnp.float32(1.0 / n_rows)
        # mean(T0) - log(mean(exp(T1))) = s0/N - (m + log(l/N))   (b2 cancels)
        res = s0_sc[...] * inv_n - (m_sc[...] + jnp.log(l_sc[...] * inv_n))
        out_ref[...] = res


def _round_up(a, b):
    return ((a + b - 1) // b) * b


def mine_forward(x, y, y_shuffle, wx, wy, b1, w2, *,
                 block_n=1024, compute_dtype=jnp.bfloat16,
                 vmem_limit_bytes=32 * 1024 * 1024):
    """MINE lower bound. Streams rows of [x|y|y_shuffle] through one fused kernel."""
    n, x_dim = x.shape
    y_dim = y.shape[1]
    hidden = wx.shape[1]
    d_in = x_dim + 2 * y_dim
    two_h = 2 * hidden

    # Tile size: multiple of 8 sublanes; pad the batch up to a whole number of tiles.
    tn = min(block_n, _round_up(n, 8))
    tn = max(8, (tn // 8) * 8)
    n_pad = _round_up(n, tn)
    needs_mask = (n_pad != n)

    # Packed row stream: one contiguous DMA stream instead of three skinny ones.
    z = jnp.concatenate([x, y, y_shuffle], axis=-1).astype(compute_dtype)
    if needs_mask:
        z = jnp.pad(z, ((0, n_pad - n), (0, 0)))

    # Fused first-layer weight: [x|y|ys] @ W == [x@Wx + y@Wy , x@Wx + ys@Wy].
    zeros_y = jnp.zeros_like(wy)
    w_fused = jnp.concatenate([
        jnp.concatenate([wx, wx], axis=1),
        jnp.concatenate([wy, zeros_y], axis=1),
        jnp.concatenate([zeros_y, wy], axis=1),
    ], axis=0).astype(compute_dtype)                          # (d_in, 2H)
    b_fused = jnp.concatenate([b1, b1], axis=-1).astype(jnp.float32)  # (1, 2H)

    # Second-layer weight as lane vectors selecting the joint / shuffled halves.
    w2_row = w2.reshape(1, hidden).astype(jnp.float32)
    zeros_h = jnp.zeros_like(w2_row)
    w2_t0 = jnp.concatenate([w2_row, zeros_h], axis=-1)       # (1, 2H)
    w2_t1 = jnp.concatenate([zeros_h, w2_row], axis=-1)       # (1, 2H)
    # NOTE: b2 is intentionally not passed -- it cancels in the final expression.

    grid = (n_pad // tn,)
    kernel = functools.partial(mine_kernel, n_rows=n, tile_rows=tn,
                               needs_mask=needs_mask)

    out = pl.pallas_call(
        kernel,
        out_shape=jax.ShapeDtypeStruct((1, 1), jnp.float32),
        grid_spec=pltpu.PrefetchScalarGridSpec(
            num_scalar_prefetch=0,
            grid=grid,
            in_specs=[
                pl.BlockSpec((tn, d_in), lambda i: (i, 0)),     # streamed rows
                pl.BlockSpec((d_in, two_h), lambda i: (0, 0)),  # pinned weights
                pl.BlockSpec((1, two_h), lambda i: (0, 0)),
                pl.BlockSpec((1, two_h), lambda i: (0, 0)),
                pl.BlockSpec((1, two_h), lambda i: (0, 0)),
            ],
            out_specs=pl.BlockSpec((1, 1), lambda i: (0, 0)),
            scratch_shapes=[
                pltpu.VMEM((1, 1), jnp.float32),   # running sum(T0)
                pltpu.VMEM((1, 1), jnp.float32),   # running max of T1
                pltpu.VMEM((1, 1), jnp.float32),   # running sum exp(T1 - m)
            ],
        ),
        compiler_params=pltpu.CompilerParams(
            dimension_semantics=("arbitrary",),
            vmem_limit_bytes=vmem_limit_bytes,
        ),
    )(z, w_fused, b_fused, w2_t0, w2_t1)
    return out[0, 0]


def init_params(key, x_dim, y_dim, hidden_size):
    """Deterministic parameter init mimicking nn.Linear default (uniform +/- 1/sqrt(fan_in))."""
    k1, k2, k3, k4 = jax.random.split(key, 4)
    in1 = x_dim + y_dim
    lim1 = 1.0 / jnp.sqrt(jnp.float32(in1))
    lim2 = 1.0 / jnp.sqrt(jnp.float32(hidden_size))
    w1 = jax.random.uniform(k1, (in1, hidden_size), jnp.float32, -lim1, lim1)
    b1 = jax.random.uniform(k2, (1, hidden_size), jnp.float32, -lim1, lim1)
    w2 = jax.random.uniform(k3, (hidden_size, 1), jnp.float32, -lim2, lim2)
    b2 = jax.random.uniform(k4, (1, 1), jnp.float32, -lim2, lim2)
    wx, wy = w1[:x_dim], w1[x_dim:]
    return wx, wy, b1, w2, b2


def mine_forward_ref(x, y, y_shuffle, wx, wy, b1, w2, b2):
    """Pure-JAX f32 reference matching the torch module (b2 included)."""
    w1 = jnp.concatenate([wx, wy], axis=0)
    t = lambda a, b: jnp.maximum(jnp.concatenate([a, b], -1) @ w1 + b1, 0.0) @ w2 + b2
    t0, t1 = t(x, y), t(x, y_shuffle)
    return jnp.mean(t0) - jnp.log(jnp.mean(jnp.exp(t1)))


if __name__ == "__main__":
    X_DIM, Y_DIM, HIDDEN = 16, 16, 32
    BLOCK_N = 128   # small tile -> exercises the pipelined multi-step reduction

    key = jax.random.PRNGKey(0)
    kx, ky, kperm, kparams = jax.random.split(key, 4)
    wx, wy, b1, w2, b2 = init_params(kparams, X_DIM, Y_DIM, HIDDEN)

    def make_inputs(n, kx, ky, kperm):
        x = jax.random.normal(kx, (n, X_DIM), jnp.float32)
        y = jax.random.normal(ky, (n, Y_DIM), jnp.float32)
        # torch.randint(sample_size, (sample_size,)) analogue (deterministic here).
        random_index = jax.random.randint(kperm, (n,), 0, n)
        y_shuffle = y[random_index]
        # TODO(synk): gather y_shuffle in-kernel from scalar-prefetched indices
        # (manual DMA gather) instead of materializing it here.
        return x, y, y_shuffle

    # Case 1: N divisible by the tile (fast, mask-free path).
    x, y, ys = make_inputs(512, kx, ky, kperm)
    lb_ref = mine_forward_ref(x, y, ys, wx, wy, b1, w2, b2)

    lb_f32 = jax.block_until_ready(
        mine_forward(x, y, ys, wx, wy, b1, w2,
                     block_n=BLOCK_N, compute_dtype=jnp.float32))
    assert jnp.allclose(lb_f32, lb_ref, atol=1e-4, rtol=1e-4), (lb_f32, lb_ref)

    lb_bf16 = jax.block_until_ready(
        mine_forward(x, y, ys, wx, wy, b1, w2, block_n=BLOCK_N))
    assert jnp.allclose(lb_bf16, lb_ref, atol=5e-2, rtol=5e-2), (lb_bf16, lb_ref)

    # Case 2: N NOT divisible by the tile (exercises padded + masked path).
    x2, y2, ys2 = make_inputs(500, ky, kx, kperm)
    lb_ref2 = mine_forward_ref(x2, y2, ys2, wx, wy, b1, w2, b2)
    lb_f32_2 = jax.block_until_ready(
        mine_forward(x2, y2, ys2, wx, wy, b1, w2,
                     block_n=BLOCK_N, compute_dtype=jnp.float32))
    assert jnp.allclose(lb_f32_2, lb_ref2, atol=1e-4, rtol=1e-4), (lb_f32_2, lb_ref2)

    print("KERNEL_OK")
</pallas_src>

<mosaic_0001>
module attributes {stable_mosaic.version = 11 : i64} {
  func.func @mine_kernel(%arg0: i32, %arg1: memref<128x48xf32, #tpu.memory_space<vmem>>, %arg2: memref<48x64xf32, #tpu.memory_space<vmem>>, %arg3: memref<1x64xf32, #tpu.memory_space<vmem>>, %arg4: memref<1x64xf32, #tpu.memory_space<vmem>>, %arg5: memref<1x64xf32, #tpu.memory_space<vmem>>, %arg6: memref<1x1xf32, #tpu.memory_space<vmem>>, %arg7: memref<1x1xf32, #tpu.memory_space<vmem>>, %arg8: memref<1x1xf32, #tpu.memory_space<vmem>>, %arg9: memref<1x1xf32, #tpu.memory_space<vmem>>) attributes {dimension_semantics = [#tpu.dimension_semantics<arbitrary>], iteration_bounds = array<i64: 4>, scalar_prefetch = 0 : i64, scratch_operands = 3 : i64, tpu.core_type = #tpu.core_type<tc>, window_params = [{transform_indices = @transform_0, window_bounds = array<i64: 128, 48>}, {pipeline_mode = #tpu.pipeline_mode<synchronous>, transform_indices = @transform_1, window_bounds = array<i64: 48, 64>}, {pipeline_mode = #tpu.pipeline_mode<synchronous>, transform_indices = @transform_2, window_bounds = array<i64: 1, 64>}, {pipeline_mode = #tpu.pipeline_mode<synchronous>, transform_indices = @transform_3, window_bounds = array<i64: 1, 64>}, {pipeline_mode = #tpu.pipeline_mode<synchronous>, transform_indices = @transform_4, window_bounds = array<i64: 1, 64>}, {pipeline_mode = #tpu.pipeline_mode<synchronous>, transform_indices = @transform_5, window_bounds = array<i64: 1, 1>}]} {
    %c0_i32 = arith.constant 0 : i32
    %0 = arith.cmpi eq, %arg0, %c0_i32 : i32
    %1 = arith.extui %0 : i1 to i32
    %c0_i32_0 = arith.constant 0 : i32
    %2 = arith.cmpi ne, %1, %c0_i32_0 : i32
    scf.if %2 {
      %cst_29 = arith.constant 0.000000e+00 : f32
      %44 = vector.broadcast %cst_29 : f32 to vector<1x1xf32>
      %c0_30 = arith.constant 0 : index
      %c0_31 = arith.constant 0 : index
      %45 = vector.load %arg7[%c0_30, %c0_31] : memref<1x1xf32, #tpu.memory_space<vmem>>, vector<1x1xf32>
      tpu.vector_store %arg7[%c0_30, %c0_31], %44 {strides = array<i32>} : memref<1x1xf32, #tpu.memory_space<vmem>>, vector<1x1xf32>,
      %cst_32 = arith.constant 0xFF800000 : f32
      %46 = vector.broadcast %cst_32 : f32 to vector<1x1xf32>
      %c0_33 = arith.constant 0 : index
      %c0_34 = arith.constant 0 : index
      %47 = vector.load %arg8[%c0_33, %c0_34] : memref<1x1xf32, #tpu.memory_space<vmem>>, vector<1x1xf32>
      tpu.vector_store %arg8[%c0_33, %c0_34], %46 {strides = array<i32>} : memref<1x1xf32, #tpu.memory_space<vmem>>, vector<1x1xf32>,
      %cst_35 = arith.constant 0.000000e+00 : f32
      %48 = vector.broadcast %cst_35 : f32 to vector<1x1xf32>
      %c0_36 = arith.constant 0 : index
      %c0_37 = arith.constant 0 : index
      %49 = vector.load %arg9[%c0_36, %c0_37] : memref<1x1xf32, #tpu.memory_space<vmem>>, vector<1x1xf32>
      tpu.vector_store %arg9[%c0_36, %c0_37], %48 {strides = array<i32>} : memref<1x1xf32, #tpu.memory_space<vmem>>, vector<1x1xf32>,
    } else {
    }
    %c0 = arith.constant 0 : index
    %c0_1 = arith.constant 0 : index
    %3 = vector.load %arg1[%c0, %c0_1] : memref<128x48xf32, #tpu.memory_space<vmem>>, vector<128x48xf32>
    %c0_2 = arith.constant 0 : index
    %c0_3 = arith.constant 0 : index
    %4 = vector.load %arg2[%c0_2, %c0_3] : memref<48x64xf32, #tpu.memory_space<vmem>>, vector<48x64xf32>
    %cst = arith.constant dense<0.000000e+00> : vector<128x64xf32>
    %5 = tpu.matmul %3, %4, %cst {dimension_numbers = #tpu.dot_dimension_numbers<[1], [0], [0], [1], [0, 0, 1, 1], [], []>} : vector<128x48xf32>, vector<48x64xf32>, vector<128x64xf32> -> vector<128x64xf32>
    %c0_4 = arith.constant 0 : index
    %c0_5 = arith.constant 0 : index
    %6 = vector.load %arg3[%c0_4, %c0_5] : memref<1x64xf32, #tpu.memory_space<vmem>>, vector<1x64xf32>
    %7 = vector.broadcast %6 : vector<1x64xf32> to vector<128x64xf32>
    %8 = arith.addf %5, %7 : vector<128x64xf32>
    %cst_6 = arith.constant 0.000000e+00 : f32
    %9 = vector.broadcast %cst_6 : f32 to vector<128x64xf32>
    %10 = arith.maximumf %8, %9 : vector<128x64xf32>
    %cst_7 = arith.constant dense<0.000000e+00> : vector<64xf32>
    %11 = vector.multi_reduction <add>, %10, %cst_7 [0] : vector<128x64xf32> to vector<64xf32>
    %12 = vector.shape_cast %11 : vector<64xf32> to vector<1x64xf32>
    %c0_8 = arith.constant 0 : index
    %c0_9 = arith.constant 0 : index
    %13 = vector.load %arg7[%c0_8, %c0_9] : memref<1x1xf32, #tpu.memory_space<vmem>>, vector<1x1xf32>
    %c0_10 = arith.constant 0 : index
    %c0_11 = arith.constant 0 : index
    %14 = vector.load %arg4[%c0_10, %c0_11] : memref<1x64xf32, #tpu.memory_space<vmem>>, vector<1x64xf32>
    %15 = arith.mulf %12, %14 : vector<1x64xf32>
    %cst_12 = arith.constant dense<0.000000e+00> : vector<1xf32>
    %16 = vector.multi_reduction <add>, %15, %cst_12 [1] : vector<1x64xf32> to vector<1xf32>
    %17 = vector.shape_cast %16 : vector<1xf32> to vector<1x1xf32>
    %18 = arith.addf %13, %17 : vector<1x1xf32>
    %c0_13 = arith.constant 0 : index
    %c0_14 = arith.constant 0 : index
    %19 = vector.load %arg7[%c0_13, %c0_14] : memref<1x1xf32, #tpu.memory_space<vmem>>, vector<1x1xf32>
    tpu.vector_store %arg7[%c0_13, %c0_14], %18 {strides = array<i32>} : memref<1x1xf32, #tpu.memory_space<vmem>>, vector<1x1xf32>,
    %c0_15 = arith.constant 0 : index
    %c0_16 = arith.constant 0 : index
    %20 = vector.load %arg5[%c0_15, %c0_16] : memref<1x64xf32, #tpu.memory_space<vmem>>, vector<1x64xf32>
    %21 = vector.broadcast %20 : vector<1x64xf32> to vector<128x64xf32>
    %22 = arith.mulf %10, %21 : vector<128x64xf32>
    %cst_17 = arith.constant dense<0.000000e+00> : vector<128xf32>
    %23 = vector.multi_reduction <add>, %22, %cst_17 [1] : vector<128x64xf32> to vector<128xf32>
    %24 = vector.shape_cast %23 : vector<128xf32> to vector<128x1xf32>
    %c0_18 = arith.constant 0 : index
    %c0_19 = arith.constant 0 : index
    %25 = vector.load %arg8[%c0_18, %c0_19] : memref<1x1xf32, #tpu.memory_space<vmem>>, vector<1x1xf32>
    %cst_20 = arith.constant dense<0xFF800000> : vector<1xf32>
    %26 = vector.multi_reduction <maximumf>, %24, %cst_20 [0] : vector<128x1xf32> to vector<1xf32>
    %27 = vector.shape_cast %26 : vector<1xf32> to vector<1x1xf32>
    %28 = arith.maximumf %25, %27 : vector<1x1xf32>
    %29 = vector.broadcast %28 : vector<1x1xf32> to vector<128x1xf32>
    %30 = arith.subf %24, %29 : vector<128x1xf32>
    %31 = math.exp %30 : vector<128x1xf32>
    %cst_21 = arith.constant dense<0.000000e+00> : vector<1xf32>
    %32 = vector.multi_reduction <add>, %31, %cst_21 [0] : vector<128x1xf32> to vector<1xf32>
    %33 = vector.shape_cast %32 : vector<1xf32> to vector<1x1xf32>
    %c0_22 = arith.constant 0 : index
    %c0_23 = arith.constant 0 : index
    %34 = vector.load %arg9[%c0_22, %c0_23] : memref<1x1xf32, #tpu.memory_space<vmem>>, vector<1x1xf32>
    %35 = arith.subf %25, %28 : vector<1x1xf32>
    %36 = math.exp %35 : vector<1x1xf32>
    %37 = arith.mulf %34, %36 : vector<1x1xf32>
    %38 = arith.addf %37, %33 : vector<1x1xf32>
    %c0_24 = arith.constant 0 : index
    %c0_25 = arith.constant 0 : index
    %39 = vector.load %arg9[%c0_24, %c0_25] : memref<1x1xf32, #tpu.memory_space<vmem>>, vector<1x1xf32>
    tpu.vector_store %arg9[%c0_24, %c0_25], %38 {strides = array<i32>} : memref<1x1xf32, #tpu.memory_space<vmem>>, vector<1x1xf32>,
    %c0_26 = arith.constant 0 : index
    %c0_27 = arith.constant 0 : index
    %40 = vector.load %arg8[%c0_26, %c0_27] : memref<1x1xf32, #tpu.memory_space<vmem>>, vector<1x1xf32>
    tpu.vector_store %arg8[%c0_26, %c0_27], %28 {strides = array<i32>} : memref<1x1xf32, #tpu.memory_space<vmem>>, vector<1x1xf32>,
    %c3_i32 = arith.constant 3 : i32
    %41 = arith.cmpi eq, %arg0, %c3_i32 : i32
    %42 = arith.extui %41 : i1 to i32
    %c0_i32_28 = arith.constant 0 : i32
    %43 = arith.cmpi ne, %42, %c0_i32_28 : i32
    scf.if %43 {
      %c0_29 = arith.constant 0 : index
      %c0_30 = arith.constant 0 : index
      %44 = vector.load %arg7[%c0_29, %c0_30] : memref<1x1xf32, #tpu.memory_space<vmem>>, vector<1x1xf32>
      %cst_31 = arith.constant 0.001953125 : f32
      %45 = vector.broadcast %cst_31 : f32 to vector<1x1xf32>
      %46 = arith.mulf %44, %45 : vector<1x1xf32>
      %c0_32 = arith.constant 0 : index
      %c0_33 = arith.constant 0 : index
      %47 = vector.load %arg8[%c0_32, %c0_33] : memref<1x1xf32, #tpu.memory_space<vmem>>, vector<1x1xf32>
      %c0_34 = arith.constant 0 : index
      %c0_35 = arith.constant 0 : index
      %48 = vector.load %arg9[%c0_34, %c0_35] : memref<1x1xf32, #tpu.memory_space<vmem>>, vector<1x1xf32>
      %cst_36 = arith.constant 0.001953125 : f32
      %49 = vector.broadcast %cst_36 : f32 to vector<1x1xf32>
      %50 = arith.mulf %48, %49 : vector<1x1xf32>
      %51 = math.log %50 : vector<1x1xf32>
      %52 = arith.addf %47, %51 : vector<1x1xf32>
      %53 = arith.subf %46, %52 : vector<1x1xf32>
      %c0_37 = arith.constant 0 : index
      %c0_38 = arith.constant 0 : index
      %54 = vector.load %arg6[%c0_37, %c0_38] : memref<1x1xf32, #tpu.memory_space<vmem>>, vector<1x1xf32>
      tpu.vector_store %arg6[%c0_37, %c0_38], %53 {strides = array<i32>} : memref<1x1xf32, #tpu.memory_space<vmem>>, vector<1x1xf32>,
    } else {
    }
    return
  }
  func.func @transform_0(%arg0: i32) -> (i32, i32) {
    %c0_i32 = arith.constant 0 : i32
    %c0_i32_0 = arith.constant 0 : i32
    return %arg0, %c0_i32 : i32, i32
  }
  func.func @transform_1(%arg0: i32) -> (i32, i32) {
    %c0_i32 = arith.constant 0 : i32
    %c0_i32_0 = arith.constant 0 : i32
    %c0_i32_1 = arith.constant 0 : i32
    return %c0_i32, %c0_i32_0 : i32, i32
  }
  func.func @transform_2(%arg0: i32) -> (i32, i32) {
    %c0_i32 = arith.constant 0 : i32
    %c0_i32_0 = arith.constant 0 : i32
    %c0_i32_1 = arith.constant 0 : i32
    return %c0_i32, %c0_i32_0 : i32, i32
  }
  func.func @transform_3(%arg0: i32) -> (i32, i32) {
    %c0_i32 = arith.constant 0 : i32
    %c0_i32_0 = arith.constant 0 : i32
    %c0_i32_1 = arith.constant 0 : i32
    return %c0_i32, %c0_i32_0 : i32, i32
  }
  func.func @transform_4(%arg0: i32) -> (i32, i32) {
    %c0_i32 = arith.constant 0 : i32
    %c0_i32_0 = arith.constant 0 : i32
    %c0_i32_1 = arith.constant 0 : i32
    return %c0_i32, %c0_i32_0 : i32, i32
  }
  func.func @transform_5(%arg0: i32) -> (i32, i32) {
    %c0_i32 = arith.constant 0 : i32
    %c0_i32_0 = arith.constant 0 : i32
    %c0_i32_1 = arith.constant 0 : i32
    return %c0_i32, %c0_i32_0 : i32, i32
  }
}

</mosaic_0001>

<bundles_post_ra>
// kernel: tpu_custom_call.1
= control target key start
LH: loop header
LB: loop body
LE: loop exit
PB: predicated region body
PF: predicated region fallthrough
CT: control target
= control target key end

     0   :  { %10 = vsyncpa [#allocation6], 0  ;;  %s992_s18 = smov 0   ;;  %s1262_s0 = inlined_call_operand.vmem [shape: f32[512,48], index: 0, kind: input, shape index: {}]   ;;  %s1263_s1 = inlined_call_operand.vmem [shape: f32[48,64], index: 1, kind: input, shape index: {}]   ;;  %s1264_s2 = inlined_call_operand.vmem [shape: f32[1,64], index: 2, kind: input, shape index: {}]   ;;  %s1265_s3 = inlined_call_operand.vmem [shape: f32[1,64], index: 3, kind: input, shape index: {}]   ;;  %s1266_s4 = inlined_call_operand.vmem [shape: f32[1,64], index: 4, kind: input, shape index: {}]   ;;  %s1267_s5 = inlined_call_operand.hbm [shape: f32[1,1], index: 5, kind: output, shape index: {}]  }
   0x1 LB: > { %s998_s19 = sadd.s32 4294967295, %s957_s18   ;;  %p765_p0 = scmp.ge.s32.totalorder %s957_s18, 1  ;;  %s957_s18 = sphi %s992_s18, %s16_s18  }
   0x2   : > { %p184_p1 = scmp.lt.s32.totalorder %s957_s18, 5 }
   0x4   : > { %p185_p2 = pnand %p765_p0, %p184_p1 }
   0x5   : > { %s766_s20 = sshll.u32 (!%p185_p2), %s998_s19, 4  ;;  %p768_p4 = scmp.ne.s32.totalorder (!%p185_p2), %s998_s19, 0 }
   0x6   : > { %188 = sbr.rel (%p185_p2) target bundleno = 561 (0x231), region = 40  ;;  %p208_p3 = scmp.lt.s32.totalorder (!%p185_p2), %s766_s20, 63 }
   0xd   : > { %s1269_s20 = smov (!%p208_p3, %s766_s20), 63  ;;  %216 = sbr.rel (%p768_p4) target bundleno = 20 (0x14), region = 44 }
   0xe   : > { %s767_s21 = sshll.u32 %s1269_s20, 3  ;;  %vm217_vm0 = vcmask (!%p768_p4), 0   ;;  %v959_v0 = vmov (!%p768_p4), 0.0   ;;  %v960_v1 = vmov (!%p768_p4), -inf  }
   0xf   : > { %s1006_s24 = scalar_lea.vmem %s1262_s0, %s767_s21  ;;  %218 = vst.msk [vmem:[#allocation2] sm:$0x1] (!%p768_p4), %vm217_vm0, %v959_v0  ;;  %220 = vst.msk [vmem:[#allocation4] sm:$0x1] (!%p768_p4), %vm217_vm0, %v959_v0 }
  0x10   : > { %219 = vst.msk [vmem:[#allocation3] sm:$0x1] (!%p768_p4), %vm217_vm0, %v960_v1 }
  0x14 PF: > { %v237_v2 = vld [vmem:[%s1263_s1] sm:$0xff]  ;;  %v238_v3 = vld [vmem:[%s1263_s1 + $0x8] sm:$0xff]  ;;  %v239_v4 = vld [vmem:[%s1263_s1 + $0x10] sm:$0xff]  ;;  %vm250_vm1 = vcmask 392192   ;;  %vm460_vm2 = vcmask 523264   ;;  %vm501_vm3 = vcmask 516096  }
  0x15   : > { %v850_v5 = vpack.c.bf16 %v238_v3, %v237_v2  ;;  %v240_v6 = vld [vmem:[%s1263_s1 + $0x18] sm:$0xff]  ;;  %v241_v8 = vld [vmem:[%s1263_s1 + $0x20] sm:$0xff]  ;;  %v242_v9 = vld [vmem:[%s1263_s1 + $0x28] sm:$0xff]  ;;  %vm506_vm4 = vcmask 0   ;;  %vm656_vm5 = vcmask 7168   ;;  %p787_p5 = scmp.ne.s32.totalorder %s998_s19, 3 }
  0x16   : > { %v854_v7 = vpack.c.bf16 %v240_v6, %v239_v4  ;;  %v221_v10 = vld [vmem:[%s1006_s24] sm:$0xff]  ;;  %v858_v12 = vpack.c.bf16 %v242_v9, %v241_v8  ;;  %v222_v13 = vld [vmem:[%s1006_s24 + $0x8] sm:$0xff]  ;;  %v223_v15 = vld [vmem:[%s1006_s24 + $0x10] sm:$0xff] }
  0x17   : > { %851 = vmatprep.subr.bf16.mxu0 %v850_v5  ;;  %862 = vmatprep.subr.bf16.mxu1 %v850_v5  ;;  %v229_v11 = vld [vmem:[%s1006_s24 + $0x40] sm:$0xff]  ;;  %v230_v14 = vld [vmem:[%s1006_s24 + $0x48] sm:$0xff]  ;;  %v231_v16 = vld [vmem:[%s1006_s24 + $0x50] sm:$0xff] }
  0x18   : > { %853 = vmatpush3.bf16.msra.mxu0 %v850_v5  ;;  %865 = vmatpush3.bf16.msra.mxu1 %v850_v5  ;;  %v224_v17 = vld [vmem:[%s1006_s24 + $0x18] sm:$0xff]  ;;  %v225_v19 = vld [vmem:[%s1006_s24 + $0x20] sm:$0xff]  ;;  %v226_v21 = vld [vmem:[%s1006_s24 + $0x28] sm:$0xff] }
  0x19   : > { %855 = vmatprep.subr.bf16.mxu0 %v854_v7  ;;  %863 = vmatprep.subr.bf16.mxu1 %v854_v7  ;;  %v232_v18 = vld [vmem:[%s1006_s24 + $0x58] sm:$0xff]  ;;  %v233_v20 = vld [vmem:[%s1006_s24 + $0x60] sm:$0xff]  ;;  %v234_v22 = vld [vmem:[%s1006_s24 + $0x68] sm:$0xff] }
  0x1a   : > { %826 = vmatprep.mubr.msk.f32.mxu0 %vm250_vm1, %v221_v10  ;;  %838 = vmatprep.mubr.msk.f32.mxu1 %vm250_vm1, %v229_v11  ;;  %v227_v23 = vld [vmem:[%s1006_s24 + $0x30] sm:$0xff]  ;;  %v228_v25 = vld [vmem:[%s1006_s24 + $0x38] sm:$0xff]  ;;  %v1062_v27 = vld [vmem:[%s1264_s2] ss:$0 sm:$0xff] }
  0x1b   : > { %v235_v24 = vld [vmem:[%s1006_s24 + $0x70] sm:$0xff]  ;;  %v236_v26 = vld [vmem:[%s1006_s24 + $0x78] sm:$0xff]  ;;  %v1073_v37 = vld [vmem:[%s1266_s4] ss:$0 sm:$0xff] }
  0x1c   : > { %857 = vmatpush3.bf16.msra.mxu0 %v854_v7  ;;  %866 = vmatpush3.bf16.msra.mxu1 %v854_v7 }
  0x1d   : > { %859 = vmatprep.subr.bf16.mxu0 %v858_v12  ;;  %864 = vmatprep.subr.bf16.mxu1 %v858_v12 }
  0x20   : > { %861 = vmatpush3.bf16.msra.mxu0 %v858_v12  ;;  %867 = vmatpush3.bf16.msra.mxu1 %v858_v12 }
  0x23   : > { %827 = vmatmul.mubr.msk.f32.vlgmr.msra.gmra.mrb[0].mxu0 %vm250_vm1, %v222_v13  ;;  %839 = vmatmul.mubr.msk.f32.vlgmr.msra.gmra.mrb[0].mxu1 %vm250_vm1, %v230_v14 }
  0x24   : > { %829 = vmatprep.mubr.msk.f32.mxu0 %vm250_vm1, %v223_v15  ;;  %841 = vmatprep.mubr.msk.f32.mxu1 %vm250_vm1, %v231_v16 }
  0x27   : > { %830 = vmatmul.mubr.msk.f32.gmra.mrb[2].mxu0 %vm250_vm1, %v224_v17  ;;  %842 = vmatmul.mubr.msk.f32.gmra.mrb[2].mxu1 %vm250_vm1, %v232_v18 }
  0x28   : > { %832 = vmatprep.mubr.msk.f32.mxu0 %vm250_vm1, %v225_v19  ;;  %844 = vmatprep.mubr.msk.f32.mxu1 %vm250_vm1, %v233_v20 }
  0x2b   : > { %833 = vmatmul.mubr.msk.f32.gmra.mrb[4].mxu0 %vm250_vm1, %v226_v21  ;;  %845 = vmatmul.mubr.msk.f32.gmra.mrb[4].mxu1 %vm250_vm1, %v234_v22 }
  0x2c   : > { %835 = vmatprep.mubr.msk.f32.mxu0 %vm250_vm1, %v227_v23  ;;  %847 = vmatprep.mubr.msk.f32.mxu1 %vm250_vm1, %v235_v24 }
  0x2f   : > { %836 = vmatmul.mubr.msk.f32.gmra.mrb[6].mxu0 %vm250_vm1, %v228_v25  ;;  %848 = vmatmul.mubr.msk.f32.gmra.mrb[6].mxu1 %vm250_vm1, %v236_v26 }
  0xf6   : > { %v828_v28 = vpop.f32.mrb[0].mxu0  ;;  %v840_v29 = vpop.f32.mrb[0].mxu1 }
  0xf7   : > { %v371_v30 = vadd.f32 %v828_v28, %v1062_v27  ;;  %v1066_v31 = vadd.f32 %v840_v29, %v1062_v27  ;;  %v365_v32 = vpop.f32.mrb[1].mxu0  ;;  %v405_v33 = vpop.f32.mrb[1].mxu1 }
  0xf8   : > { %v366_v34 = vadd.f32 %v1062_v27, %v365_v32  ;;  %v1077_v42 = vadd.f32 %v1062_v27, %v405_v33 }
  0xf9   : > { %v445_v35 = vmax.f32 %v371_v30, 0.0  ;;  %v453_v36 = vmax.f32 %v1066_v31, 0.0 }
  0xfa   : > { %v444_v38 = vmax.f32 %v366_v34, 0.0  ;;  %v831_v39 = vpop.f32.mrb[2].mxu0  ;;  %v843_v40 = vpop.f32.mrb[2].mxu1  ;;  %v452_v60 = vmax.f32 %v1077_v42, 0.0 }
  0xfb   : > { %v462_v41 = vsel %vm460_vm2, %v445_v35, 0.0  ;;  %v381_v43 = vadd.f32 %v831_v39, %v1062_v27  ;;  %v375_v44 = vpop.f32.mrb[3].mxu0  ;;  %v1081_v45 = vadd.f32 %v843_v40, %v1062_v27  ;;  %v415_v46 = vpop.f32.mrb[3].mxu1  ;;  %v524_v49 = vmul.f32 %v1073_v37, %v453_v36 }
  0xfc   : > { %v461_v47 = vsel %vm460_vm2, %v444_v38, 0.0  ;;  %v376_v48 = vadd.f32 %v1062_v27, %v375_v44  ;;  %v1090_v53 = vadd.f32 %v1062_v27, %v415_v46  ;;  %v516_v56 = vmul.f32 %v1073_v37, %v445_v35 }
  0xfd   : > { %v463_v50 = vadd.f32 %v462_v41, %v461_v47  ;;  %v447_v51 = vmax.f32 %v381_v43, 0.0  ;;  %v455_v52 = vmax.f32 %v1081_v45, 0.0  ;;  %v558_v55 = vsel %vm460_vm2, %v524_v49, 0.0 }
  0xfe   : > { %v446_v54 = vmax.f32 %v376_v48, 0.0  ;;  %v834_v57 = vpop.f32.mrb[4].mxu0  ;;  %v515_v58 = vmul.f32 %v1073_v37, %v444_v38  ;;  %v846_v59 = vpop.f32.mrb[4].mxu1  ;;  %559 = vadd.xlane.f32.xlu1 %v558_v55  ;;  %v534_v1 = vsel %vm460_vm2, %v516_v56, 0.0  ;;  %v454_v6 = vmax.f32 %v1090_v53, 0.0 }
  0xff   : > { %v391_v61 = vadd.f32 %v834_v57, %v1062_v27  ;;  %v385_v62 = vpop.f32.mrb[5].mxu0  ;;  %v425_v63 = vpop.f32.mrb[5].mxu1  ;;  %v518_v3 = vmul.f32 %v1073_v37, %v447_v51  ;;  %v466_v4 = vsel %vm460_vm2, %v447_v51, 0.0  ;;  %535 = vadd.xlane.f32.xlu0 %v534_v1  ;;  %v526_v12 = vmul.f32 %v1073_v37, %v455_v52 }
 0x100   : > { %v464_v0 = vsel %vm460_vm2, %v446_v54, 0.0  ;;  %v386_v2 = vadd.f32 %v1062_v27, %v385_v62  ;;  %v531_v11 = vsel %vm460_vm2, %v515_v58, 0.0  ;;  %v523_v17 = vmul.f32 %v1073_v37, %v452_v60 }
 0x101   : > { %v465_v5 = vadd.f32 %v464_v0, %v463_v50  ;;  %v449_v7 = vmax.f32 %v391_v61, 0.0  ;;  %v540_v9 = vsel %vm460_vm2, %v518_v3, 0.0  ;;  %v431_v18 = vadd.f32 %v846_v59, %v1062_v27 }
 0x102   : > { %v448_v8 = vmax.f32 %v386_v2, 0.0  ;;  %v837_v10 = vpop.f32.mrb[6].mxu0  ;;  %v849_v13 = vpop.f32.mrb[6].mxu1  ;;  %541 = vadd.xlane.f32.xlu1 %v540_v9  ;;  %v564_v23 = vsel %vm460_vm2, %v526_v12, 0.0  ;;  %v426_v28 = vadd.f32 %v1062_v27, %v425_v63  ;;  %v517_v29 = vmul.f32 %v1073_v37, %v446_v54 }
 0x103   : > { %v467_v14 = vadd.f32 %v466_v4, %v465_v5  ;;  %v401_v15 = vadd.f32 %v837_v10, %v1062_v27  ;;  %v395_v16 = vpop.f32.mrb[7].mxu0  ;;  %v435_v19 = vpop.f32.mrb[7].mxu1  ;;  %v470_v20 = vsel %vm460_vm2, %v449_v7, 0.0  ;;  %532 = vadd.xlane.f32.xlu0 %v531_v11  ;;  %v555_v32 = vsel %vm460_vm2, %v523_v17, 0.0  ;;  %v499_v17 = vld [vmem:[%s1265_s3] sm:$0x1] }
 0x104   : > { %v468_v21 = vsel %vm460_vm2, %v448_v8, 0.0  ;;  %v396_v22 = vadd.f32 %v1062_v27, %v395_v16  ;;  %v457_v33 = vmax.f32 %v431_v18, 0.0  ;;  %v525_v38 = vmul.f32 %v1073_v37, %v454_v6 }
 0x105   : > { %v469_v24 = vadd.f32 %v468_v21, %v467_v14  ;;  %v451_v25 = vmax.f32 %v401_v15, 0.0  ;;  %v520_v39 = vmul.f32 %v1073_v37, %v449_v7  ;;  %v456_v41 = vmax.f32 %v426_v28, 0.0 }
 0x106   : > { %v450_v26 = vmax.f32 %v396_v22, 0.0  ;;  %565 = vadd.xlane.f32.xlu1 %v564_v23  ;;  %v537_v42 = vsel %vm460_vm2, %v517_v29, 0.0  ;;  %v519_v43 = vmul.f32 %v1073_v37, %v448_v8  ;;  %v476_v44 = vsel %vm460_vm2, %v452_v60, 0.0 }
 0x107   : > { %v471_v30 = vadd.f32 %v470_v20, %v469_v24  ;;  %v474_v34 = vsel %vm460_vm2, %v451_v25, 0.0  ;;  %556 = vadd.xlane.f32.xlu0 %v555_v32  ;;  %v561_v47 = vsel %vm460_vm2, %v525_v38, 0.0  ;;  %v546_v48 = vsel %vm460_vm2, %v520_v39, 0.0 }
 0x108   : > { %v472_v35 = vsel %vm460_vm2, %v450_v26, 0.0  ;;  %v441_v49 = vadd.f32 %v849_v13, %v1062_v27  ;;  %v528_v50 = vmul.f32 %v1073_v37, %v457_v33  ;;  %v478_v53 = vsel %vm460_vm2, %v453_v36, 0.0 }
 0x109   : > { %v473_v40 = vadd.f32 %v472_v35, %v471_v30  ;;  %v543_v54 = vsel %vm460_vm2, %v519_v43, 0.0  ;;  %v436_v55 = vadd.f32 %v1062_v27, %v435_v19  ;;  %v527_v56 = vmul.f32 %v1073_v37, %v456_v41 }
 0x10a   : > { %538 = vadd.xlane.f32.xlu1 %v537_v42  ;;  %v480_v58 = vsel %vm460_vm2, %v454_v6, 0.0  ;;  %v459_v59 = vmax.f32 %v441_v49, 0.0  ;;  %v570_v60 = vsel %vm460_vm2, %v528_v50, 0.0  ;;  %v522_v61 = vmul.f32 %v1073_v37, %v451_v25 }
 0x10b   : > { %v475_v46 = vadd.f32 %v474_v34, %v473_v40  ;;  %562 = vadd.xlane.f32.xlu0 %v561_v47  ;;  %v482_v31 = vsel %vm460_vm2, %v455_v52, 0.0  ;;  %v458_v36 = vmax.f32 %v436_v55, 0.0  ;;  %v567_v27 = vsel %vm460_vm2, %v527_v56, 0.0 }
 0x10c   : > { %v521_v63 = vmul.f32 %v1073_v37, %v450_v26  ;;  %v484_v1 = vsel %vm460_vm2, %v456_v41, 0.0  ;;  %v552_v2 = vsel %vm460_vm2, %v522_v61, 0.0  ;;  %v530_v3 = vmul.f32 %v1073_v37, %v459_v59 }
 0x10d   : > { %v477_v51 = vadd.f32 %v476_v44, %v475_v46  ;;  %v486_v5 = vsel %vm460_vm2, %v457_v33, 0.0  ;;  %v529_v52 = vmul.f32 %v1073_v37, %v458_v36  ;;  %v488_v7 = vsel %vm460_vm2, %v458_v36, 0.0  ;;  %v498_v36 = vld [vmem:[#allocation2] sm:$0x1] }
 0x10e   : > { %547 = vadd.xlane.f32.xlu1 %v546_v48  ;;  %v549_v45 = vsel %vm460_vm2, %v521_v63, 0.0  ;;  %v576_v8 = vsel %vm460_vm2, %v530_v3, 0.0  ;;  %v490_v10 = vsel %vm460_vm2, %v459_v59, 0.0  ;;  %v603_v59 = vlaneseq }
 0x10f   : > { %v479_v57 = vadd.f32 %v478_v53, %v477_v51  ;;  %544 = vadd.xlane.f32.xlu0 %v543_v54  ;;  %v573_v11 = vsel %vm460_vm2, %v529_v52, 0.0 }
 0x111   : > { %v481_v62 = vadd.f32 %v480_v58, %v479_v57 }
 0x112   : > { %571 = vadd.xlane.f32.xlu1 %v570_v60 }
 0x113   : > { %v483_v0 = vadd.f32 %v482_v31, %v481_v62  ;;  %568 = vadd.xlane.f32.xlu0 %v567_v27  ;;  %v604_v62 = vshrl.u32 %v603_v59, 7 }
 0x115   : > { %v485_v4 = vadd.f32 %v484_v1, %v483_v0  ;;  %v1180_v0 = vld [vmem:[#allocation3] sm:$0x1] }
 0x116   : > { %553 = vadd.xlane.f32.xlu1 %v552_v2  ;;  %v605_v2 = vsub.s32 0, %v604_v62 }
 0x117   : > { %v487_v6 = vadd.f32 %v486_v5, %v485_v4  ;;  %550 = vadd.xlane.f32.xlu0 %v549_v45 }
 0x119   : > { %v489_v9 = vadd.f32 %v488_v7, %v487_v6 }
 0x11a   : > { %577 = vadd.xlane.f32.xlu1 %v576_v8 }
 0x11b   : > { %v491_v12 = vadd.f32 %v490_v10, %v489_v9  ;;  %574 = vadd.xlane.f32.xlu0 %v573_v11 }
 0x11d   : > { %v492_v13 = vrot.slane %v491_v12, 4 }
 0x11f   : > { %v493_v14 = vadd.f32 %v492_v13, %v491_v12 }
 0x121   : > { %v494_v15 = vrot.slane %v493_v14, 2 }
 0x123   : > { %v495_v16 = vadd.f32 %v494_v15, %v493_v14 }
 0x125   : > { %v496_v37 = vrot.slane %v495_v16, 1 }
 0x127   : > { %v497_v18 = vadd.f32 %v496_v37, %v495_v16 }
 0x129   : > { %v500_v19 = vmul.f32 %v499_v17, %v497_v18 }
 0x12b   : > { %v502_v20 = vsel %vm501_vm3, %v500_v19, 0.0 }
 0x12c   : > { %503 = vadd.xlane.f32.xlu0 %v502_v20 }
 0x18b   : > { %v1156_v21 = vpop.xlane.xlu1 %559 }
 0x18c   : > { %v536_v22 = vpop.xlane.xlu0 %535 }
 0x18f   : > { %v542_v23 = vpop.xlane.xlu1 %541 }
 0x190   : > { %v533_v24 = vpop.xlane.xlu0 %532 }
 0x193   : > { %v1158_v25 = vpop.xlane.xlu1 %565 }
 0x194   : > { %v1160_v26 = vpop.xlane.xlu0 %556 }
 0x197   : > { %v539_v28 = vpop.xlane.xlu1 %538 }
 0x198   : > { %v1162_v29 = vpop.xlane.xlu0 %562 }
 0x19b   : > { %v548_v30 = vpop.xlane.xlu1 %547 }
 0x19c   : > { %v545_v32 = vpop.xlane.xlu0 %544  ;;  %v581_v34 = vmax.f32 %v536_v22, %v548_v30 }
 0x19d   : > { %v580_v35 = vmax.f32 %v533_v24, %v545_v32 }
 0x19e   : > { %v585_v40 = vmax.f32 %v581_v34, %v1156_v21 }
 0x19f   : > { %v1164_v33 = vpop.xlane.xlu1 %571  ;;  %v584_v41 = vmax.f32 %v580_v35, %v1160_v26 }
 0x1a0   : > { %v1166_v38 = vpop.xlane.xlu0 %568  ;;  %v589_v48 = vmax.f32 %v585_v40, %v1164_v33 }
 0x1a1   : > { %v588_v49 = vmax.f32 %v584_v41, %v1166_v38 }
 0x1a3   : > { %v554_v39 = vpop.xlane.xlu1 %553  ;;  %v592_v55 = vmax.f32 %v588_v49, %v589_v48 }
 0x1a4   : > { %v583_v42 = vmax.f32 %v542_v23, %v554_v39  ;;  %v551_v43 = vpop.xlane.xlu0 %550 }
 0x1a5   : > { %v582_v44 = vmax.f32 %v539_v28, %v551_v43 }
 0x1a6   : > { %v587_v46 = vmax.f32 %v583_v42, %v1158_v25 }
 0x1a7   : > { %v1171_v47 = vpop.xlane.xlu1 %577  ;;  %v586_v51 = vmax.f32 %v582_v44, %v1162_v29 }
 0x1a8   : > { %v591_v50 = vmax.f32 %v587_v46, %v1171_v47  ;;  %v1177_v53 = vpop.xlane.xlu0 %574 }
 0x1a9   : > { %v590_v54 = vmax.f32 %v586_v51, %v1177_v53 }
 0x1ab   : > { %v593_v56 = vmax.f32 %v590_v54, %v591_v50 }
 0x1ad   : > { %v594_v57 = vmax.f32 %v592_v55, %v593_v56 }
 0x1af   : > { %v595_v58 = vrot.slane %v594_v57, 4 }
 0x1b1   : > { %v596_v60 = vmax.f32 %v594_v57, %v595_v58 }
 0x1b3   : > { %v597_v61 = vrot.slane %v596_v60, 2 }
 0x1b5   : > { %v598_v31 = vmax.f32 %v596_v60, %v597_v61 }
 0x1b7   : > { %v599_v27 = vrot.slane %v598_v31, 1 }
 0x1b9   : > { %v504_v63 = vpop.xlane.xlu0 %503  ;;  %v600_v3 = vmax.f32 %v598_v31, %v599_v27 }
 0x1ba   : > { %v505_v1 = vadd.f32 %v504_v63, %v498_v36 }
 0x1bb   : > { %v1184_v4 = vmax.f32 %v1180_v0, %v600_v3 }
 0x1bc   : > { %507 = vst.msk [vmem:[#allocation2] sm:$0x1] %vm506_vm4, %v505_v1 }
 0x1bd   : > { %v1187_v5 = vrot.slane %v1184_v4, %v605_v2  ;;  %701 = vst.msk [vmem:[#allocation3] sm:$0x1] %vm506_vm4, %v1184_v4 }
 0x1bf   : > { %v608_v45 = vsub.f32 %v533_v24, %v1187_v5  ;;  %v609_v52 = vsub.f32 %v536_v22, %v1187_v5  ;;  %v610_v6 = vsub.f32 %v539_v28, %v1187_v5  ;;  %v611_v7 = vsub.f32 %v542_v23, %v1187_v5 }
 0x1c0   : > { %v612_v8 = vsub.f32 %v545_v32, %v1187_v5  ;;  %v613_v12 = vsub.f32 %v548_v30, %v1187_v5  ;;  %v614_v14 = vsub.f32 %v551_v43, %v1187_v5  ;;  %v615_v16 = vsub.f32 %v554_v39, %v1187_v5 }
 0x1c1   : > { %v624_v9 = vmul.f32 1.442695, %v608_v45  ;;  %v626_v10 = vmul.f32 1.442695, %v609_v52  ;;  %v628_v11 = vmul.f32 1.442695, %v610_v6  ;;  %v616_v17 = vsub.f32 %v1160_v26, %v1187_v5 }
 0x1c2   : > { %v630_v13 = vmul.f32 1.442695, %v611_v7  ;;  %v632_v15 = vmul.f32 1.442695, %v612_v8  ;;  %v634_v37 = vmul.f32 1.442695, %v613_v12  ;;  %v617_v19 = vsub.f32 %v1156_v21, %v1187_v5 }
 0x1c3   : > { %885 = vpow2.f32 %v624_v9  ;;  %v636_v18 = vmul.f32 1.442695, %v614_v14  ;;  %v638_v20 = vmul.f32 1.442695, %v615_v16  ;;  %v618_v22 = vsub.f32 %v1162_v29, %v1187_v5 }
 0x1c4   : > { %887 = vpow2.f32 %v626_v10  ;;  %v640_v23 = vmul.f32 1.442695, %v616_v17  ;;  %v619_v30 = vsub.f32 %v1158_v25, %v1187_v5  ;;  %v642_v26 = vmul.f32 1.442695, %v617_v19 }
 0x1c5   : > { %889 = vpow2.f32 %v628_v11  ;;  %v620_v39 = vsub.f32 %v1166_v38, %v1187_v5  ;;  %v644_v29 = vmul.f32 1.442695, %v618_v22  ;;  %v621_v25 = vsub.f32 %v1164_v33, %v1187_v5 }
 0x1c6   : > { %891 = vpow2.f32 %v630_v13  ;;  %v646_v43 = vmul.f32 1.442695, %v619_v30  ;;  %v622_v49 = vsub.f32 %v1177_v53, %v1187_v5  ;;  %v623_v55 = vsub.f32 %v1171_v47, %v1187_v5  ;;  %v694_v30 = vld [vmem:[#allocation4] sm:$0x1] }
 0x1c7   : > { %893 = vpow2.f32 %v632_v15  ;;  %v648_v38 = vmul.f32 1.442695, %v620_v39  ;;  %v650_v33 = vmul.f32 1.442695, %v621_v25  ;;  %v695_v9 = vsub.f32 %v1180_v0, %v1184_v4 }
 0x1c8   : > { %895 = vpow2.f32 %v634_v37  ;;  %v652_v59 = vmul.f32 1.442695, %v622_v49  ;;  %v654_v62 = vmul.f32 1.442695, %v623_v55 }
 0x1c9   : > { %897 = vpow2.f32 %v636_v18  ;;  %v696_v16 = vmul.f32 1.442695, %v695_v9 }
 0x1ca   : > { %899 = vpow2.f32 %v638_v20 }
 0x1cb   : > { %901 = vpow2.f32 %v640_v23 }
 0x1cc   : > { %903 = vpow2.f32 %v642_v26 }
 0x1cd   : > { %v886_v24 = vpop.eup %885  ;;  %905 = vpow2.f32 %v644_v29  ;;  %v706_v29 = vld [vmem:[#allocation2] sm:$0x1] (!%p787_p5) }
 0x1ce   : > { %v888_v28 = vpop.eup %887  ;;  %v657_v32 = vsel %vm656_vm5, %v886_v24, 0.0  ;;  %907 = vpow2.f32 %v646_v43 }
 0x1cf   : > { %v890_v34 = vpop.eup %889  ;;  %v658_v21 = vsel %vm656_vm5, %v888_v28, 0.0  ;;  %909 = vpow2.f32 %v648_v38 }
 0x1d0   : > { %v892_v35 = vpop.eup %891  ;;  %v659_v40 = vadd.f32 %v658_v21, %v657_v32  ;;  %v660_v41 = vsel %vm656_vm5, %v890_v34, 0.0  ;;  %911 = vpow2.f32 %v650_v33 }
 0x1d1   : > { %v894_v42 = vpop.eup %893  ;;  %v662_v46 = vsel %vm656_vm5, %v892_v35, 0.0  ;;  %913 = vpow2.f32 %v652_v59 }
 0x1d2   : > { %v661_v44 = vadd.f32 %v660_v41, %v659_v40  ;;  %v896_v48 = vpop.eup %895  ;;  %v664_v51 = vsel %vm656_vm5, %v894_v42, 0.0  ;;  %915 = vpow2.f32 %v654_v62  ;;  %v708_v41 = vld [vmem:[#allocation3] sm:$0x1] (!%p787_p5)  ;;  %v707_v42 = vmul.f32 (!%p787_p5), 0.001953125, %v706_v29 }
 0x1d3   : > { %v898_v54 = vpop.eup %897  ;;  %v666_v57 = vsel %vm656_vm5, %v896_v48, 0.0  ;;  %917 = vpow2.f32 %v696_v16 }
 0x1d4   : > { %v663_v50 = vadd.f32 %v662_v46, %v661_v44  ;;  %v900_v58 = vpop.eup %899  ;;  %v668_v53 = vsel %vm656_vm5, %v898_v54, 0.0 }
 0x1d5   : > { %v902_v61 = vpop.eup %901  ;;  %v670_v36 = vsel %vm656_vm5, %v900_v58, 0.0 }
 0x1d6   : > { %v665_v56 = vadd.f32 %v664_v51, %v663_v50  ;;  %v904_v27 = vpop.eup %903  ;;  %v672_v63 = vsel %vm656_vm5, %v902_v61, 0.0 }
 0x1d7   : > { %v906_v1 = vpop.eup %905  ;;  %v674_v3 = vsel %vm656_vm5, %v904_v27, 0.0 }
 0x1d8   : > { %v667_v60 = vadd.f32 %v666_v57, %v665_v56  ;;  %v908_v5 = vpop.eup %907  ;;  %v676_v52 = vsel %vm656_vm5, %v906_v1, 0.0 }
 0x1d9   : > { %v910_v6 = vpop.eup %909  ;;  %v678_v8 = vsel %vm656_vm5, %v908_v5, 0.0 }
 0x1da   : > { %v669_v31 = vadd.f32 %v668_v53, %v667_v60  ;;  %v912_v10 = vpop.eup %911  ;;  %v680_v12 = vsel %vm656_vm5, %v910_v6, 0.0 }
 0x1db   : > { %v914_v13 = vpop.eup %913  ;;  %v682_v15 = vsel %vm656_vm5, %v912_v10, 0.0 }
 0x1dc   : > { %v671_v47 = vadd.f32 %v670_v36, %v669_v31  ;;  %v916_v37 = vpop.eup %915  ;;  %v684_v18 = vsel %vm656_vm5, %v914_v13, 0.0 }
 0x1dd   : > { %v686_v20 = vsel %vm656_vm5, %v916_v37, 0.0  ;;  %v918_v28 = vpop.eup %917 }
 0x1de   : > { %v673_v2 = vadd.f32 %v672_v63, %v671_v47  ;;  %v698_v34 = vmul.f32 %v918_v28, %v694_v30 }
 0x1e0   : > { %v675_v45 = vadd.f32 %v674_v3, %v673_v2 }
 0x1e2   : > { %v677_v7 = vadd.f32 %v676_v52, %v675_v45 }
 0x1e4   : > { %v679_v11 = vadd.f32 %v678_v8, %v677_v7 }
 0x1e6   : > { %v681_v14 = vadd.f32 %v680_v12, %v679_v11 }
 0x1e8   : > { %v683_v17 = vadd.f32 %v682_v15, %v681_v14 }
 0x1ea   : > { %v685_v19 = vadd.f32 %v684_v18, %v683_v17 }
 0x1ec   : > { %v687_v22 = vadd.f32 %v686_v20, %v685_v19 }
 0x1ee   : > { %v688_v23 = vrot.slane %v687_v22, 4 }
 0x1f0   : > { %v689_v0 = vadd.f32 %v688_v23, %v687_v22 }
 0x1f2   : > { %v690_v4 = vrot.slane %v689_v0, 2 }
 0x1f4   : > { %v691_v24 = vadd.f32 %v690_v4, %v689_v0 }
 0x1f6   : > { %v692_v26 = vrot.slane %v691_v24, 1  ;;  %705 = sbr.rel (%p787_p5) target bundleno = 536 (0x218), region = 48 }
 0x1f8   : > { %v693_v32 = vadd.f32 %v692_v26, %v691_v24 }
 0x1fa   : > { %v699_v21 = vadd.f32 %v698_v34, %v693_v32 }
 0x1fc   : > { %700 = vst.msk [vmem:[#allocation4] sm:$0x1] %vm506_vm4, %v699_v21 }
 0x203   : > { %v709_v35 = vld [vmem:[#allocation4] sm:$0x1] }
 0x204   : > { %v710_v39 = vmul.f32 0.001953125, %v709_v35 }
 0x206   : > { %919 = vlog2.f32 %v710_v39 }
 0x210   : > { %v920_v40 = vpop.eup %919 }
 0x211   : > { %v712_v25 = vmul.f32 0.6931472, %v920_v40 }
 0x213   : > { %v713_v43 = vadd.f32 %v712_v25, %v708_v41 }
 0x215   : > { %v714_v44 = vsub.f32 %v707_v42, %v713_v43 }
 0x217   : > { %715 = vst.msk [vmem:[#allocation5] sm:$0x1] %vm506_vm4, %v714_v44 }
 0x218 PF: > { %p872_p6 = scmp.eq.s32.totalorder %s998_s19, 3  ;;  %s961_s20 = smov [#allocation5]  }
 0x219   : > { %s723_s21 = sshll.u32 %s961_s20, 4  ;;  %s724_s21 = int_to_ptr.vmem [resolvable:$true] %s723_s21 }
 0x21a   : > { %s921_s22 = scalar_lea.vmem %s724_s21, 16  ;;  %s927_s23 = scalar_lea.vmem %s724_s21, 32 }
 0x21b   : > { %p922_p7 = scmp.ne.s32.totalorder %s724_s21, %s921_s22  ;;  %p928_p10 = scmp.lt.s32.totalorder %s724_s21, %s724_s21 }
 0x21c   : > { %p929_p11 = scmp.lt.s32.totalorder %s927_s23, %s921_s22 }
 0x21d   : > { %p923_p8 = pnand %p922_p7, %p872_p6 }
 0x21e   : > { %p930_p12 = por %p929_p11, %p928_p10 }
 0x21f   : > { %p924_p9 = pneg %p923_p8 }
 0x221   : > { %p931_p13 = pnand %p930_p12, %p924_p9 }
 0x223   : > { %934 = shalt.err (!%p931_p13)
}
 0x224   : > { %s935_s26 = scalar_lea.hbm %s1267_s5, 16 }
 0x225   : > { %p936_p0 = scmp.ne.s32.totalorder %s1267_s5, %s935_s26  ;;  %p941_p3 = scmp.lt.u32.totalorder %s935_s26, %s1267_s5 }
 0x227   : > { %p937_p1 = pnand %p936_p0, %p872_p6 }
 0x229   : > { %p938_p2 = pneg %p937_p1 }
 0x22b   : > { %p943_p4 = pnand %p941_p3, %p938_p2 }
 0x22d   : > { %946 = shalt.err (!%p943_p4)
}
 0x22e   : > { %869 = dma.vmem_to_hbm [thread:$0]  (%p872_p6), %s724_s21, 16, %s1267_s5, [#allocation6]  }
 0x22f   : > { %952 = dma.done.wait (%p872_p6), [#allocation6], 16  }
 0x230   : > { %954 = vsyncadd (%p872_p6), [#allocation6], 4294967280 }
 0x231 PF: > { %s16_s18 = sadd.s32 1, %s957_s18  }
 0x232   : > { %p13_p5 = scmp.ge.s32.totalorder %s16_s18, 6  }
 0x234   :  { %15 = sbr.rel (!%p13_p5) target bundleno = 1 (0x1), region = 75 }
 0x23b   :  { %736 = vsyncpa [#allocation6], 1 }
 0x23c   :  { %738 = vsyncpa [#allocation6 + $0x1], 1 }

</bundles_post_ra>
